<compile_context>
chip_gen: v7x
topology: tpu7x:2x2x1
jax: 0.10.0
libtpu: 0.0.40
codegen_flags: <defaults>
</compile_context>

<pallas_src>
import jax
import jax.numpy as jnp
from jax.experimental import pallas as pl
from jax.experimental.pallas import tpu as pltpu


def _repeat_kernel(x_ref, o_ref):
    # One input row-tile -> `repeats` identical output slabs.
    # Single vld pass of the tile, `repeats` unmasked vst passes.
    x = x_ref[...]
    for r in range(o_ref.shape[0]):          # static trip count == repeats
        o_ref[r, :, :] = x


def _pick_lanes(n: int, max_lanes: int = 4096) -> int:
    """Largest multiple of 128 that divides n and is <= max_lanes (0 if none)."""
    best = 0
    k = 1
    while 128 * k <= max_lanes:
        if n % (128 * k) == 0:
            best = 128 * k
        k += 1
    return best


def _pick_tile_r(rows: int, lanes: int, itemsize: int, repeats: int) -> int:
    """Row-tile size: divisor of `rows` (no ragged tail) that is a multiple of the
    dtype's sublane packing, near ~2 MiB per input tile, leaving >= 2 tiles when
    possible so the parallel grid axis can span both v7x TensorCores."""
    sub = 8 * max(1, 4 // itemsize)           # 8 (f32) / 16 (bf16) / 32 (int8, fp8)
    # ~2 MiB at repeats=3; shrink as repeats grows so double-buffered VMEM
    # (2*(1+repeats)*tile_bytes) stays ~16 MiB on every chip.
    target_bytes = max(1 << 19, (8 << 20) // (1 + repeats))
    target_rows = max(sub, target_bytes // (lanes * itemsize))
    if rows <= sub:
        return rows                            # full-extent block is always legal
    cap = min(target_rows, max(sub, rows // 2))
    best = 0
    d = sub
    while d <= cap:
        if rows % d == 0:
            best = d
        d += sub
    if best:
        return best
    # No clean divisor near the target: accept a bounds-masked partial tail tile.
    return min(rows, max(sub, (target_rows // sub) * sub))


def channel_repeat(x: jax.Array, repeats: int = 3) -> jax.Array:
    """Equivalent of torch `x.repeat(repeats, 1, 1)` for a 3-D (C, H, W) array."""
    assert x.ndim == 3, "ChannelRepeat.forward expects a (C, H, W) tensor"
    C, H, W = x.shape
    n = C * H * W
    itemsize = jnp.dtype(x.dtype).itemsize

    lanes = _pick_lanes(n)
    out_bytes = repeats * n * itemsize

    # Fast path: tiny outputs (pure launch overhead) or shapes that cannot be
    # made lane-dense without padding -> let XLA fuse the broadcast.
    if lanes == 0 or out_bytes < (1 << 20):
        return jnp.tile(x, (repeats, 1, 1))

    rows = n // lanes
    tile_r = _pick_tile_r(rows, lanes, itemsize, repeats)
    num_tiles = pl.cdiv(rows, tile_r)

    tile_bytes = tile_r * lanes * itemsize
    # 2 input buffers + 2 output buffers of size repeats*tile, plus headroom.
    needed = 2 * (1 + repeats) * tile_bytes
    vmem_limit = int(min(64 << 20, max(needed + (4 << 20), 32 << 20)))

    out3d = pl.pallas_call(
        _repeat_kernel,
        out_shape=jax.ShapeDtypeStruct((repeats, rows, lanes), x.dtype),
        grid_spec=pltpu.PrefetchScalarGridSpec(
            num_scalar_prefetch=0,
            grid=(num_tiles,),
            in_specs=[
                pl.BlockSpec((tile_r, lanes), lambda t: (t, 0)),
            ],
            # One block per step carries all `repeats` copies of the row-tile.
            out_specs=pl.BlockSpec((repeats, tile_r, lanes), lambda t: (0, t, 0)),
        ),
        compiler_params=pltpu.CompilerParams(
            dimension_semantics=("parallel",),
            vmem_limit_bytes=vmem_limit,
        ),
        cost_estimate=pl.CostEstimate(
            flops=0,
            transcendentals=0,
            bytes_accessed=(repeats + 1) * n * itemsize,
        ),
    )(x.reshape(rows, lanes))

    # Row-major reshapes only: (repeats, rows*lanes) == (repeats, C*H*W).
    return out3d.reshape(repeats * C, H, W)


if __name__ == "__main__":
    key = jax.random.PRNGKey(0)
    k1, k2, k3 = jax.random.split(key, 3)
    repeats = 3

    # Small (C, H, W) input consistent with the module's forward -> fast path.
    x_small = jax.random.normal(k1, (4, 16, 16), dtype=jnp.float32)
    out_small = jax.block_until_ready(channel_repeat(x_small, repeats))
    assert out_small.shape == (12, 16, 16), out_small.shape
    assert out_small.dtype == x_small.dtype
    assert bool(jnp.array_equal(out_small, jnp.tile(x_small, (repeats, 1, 1))))

    # f32 input large enough to exercise the tiled, lane-dense Pallas path
    # (2 parallel row-tiles, folded repeats).
    x_f32 = jax.random.normal(k2, (8, 128, 128), dtype=jnp.float32)
    out_f32 = jax.block_until_ready(channel_repeat(x_f32, repeats))
    assert out_f32.shape == (24, 128, 128), out_f32.shape
    assert out_f32.dtype == x_f32.dtype
    assert bool(jnp.array_equal(out_f32, jnp.tile(x_f32, (repeats, 1, 1))))

    # bf16 input: exercises the dtype-aware (16-row) sublane tiling path.
    x_bf16 = jax.random.normal(k3, (16, 128, 128), dtype=jnp.bfloat16)
    out_bf16 = jax.block_until_ready(channel_repeat(x_bf16, repeats))
    assert out_bf16.shape == (48, 128, 128), out_bf16.shape
    assert out_bf16.dtype == x_bf16.dtype
    assert bool(jnp.array_equal(out_bf16, jnp.tile(x_bf16, (repeats, 1, 1))))

    print("KERNEL_OK")
</pallas_src>

<mosaic_0001>
module attributes {stable_mosaic.version = 11 : i64} {
  func.func @_repeat_kernel(%arg0: i32, %arg1: memref<16x4096xf32, #tpu.memory_space<vmem>>, %arg2: memref<3x16x4096xf32, #tpu.memory_space<vmem>>) attributes {dimension_semantics = [#tpu.dimension_semantics<parallel>], iteration_bounds = array<i64: 2>, scalar_prefetch = 0 : i64, scratch_operands = 0 : i64, tpu.core_type = #tpu.core_type<tc>, window_params = [{transform_indices = @transform_0, window_bounds = array<i64: 16, 4096>}, {transform_indices = @transform_1, window_bounds = array<i64: 3, 16, 4096>}]} {
    %c0 = arith.constant 0 : index
    %c0_0 = arith.constant 0 : index
    %0 = vector.load %arg1[%c0, %c0_0] : memref<16x4096xf32, #tpu.memory_space<vmem>>, vector<16x4096xf32>
    %c0_1 = arith.constant 0 : index
    %c0_2 = arith.constant 0 : index
    %c0_3 = arith.constant 0 : index
    %1 = vector.load %arg2[%c0_1, %c0_2, %c0_3] : memref<3x16x4096xf32, #tpu.memory_space<vmem>>, vector<1x16x4096xf32>
    %2 = vector.shape_cast %1 : vector<1x16x4096xf32> to vector<16x4096xf32>
    %3 = vector.shape_cast %0 : vector<16x4096xf32> to vector<1x16x4096xf32>
    tpu.vector_store %arg2[%c0_1, %c0_2, %c0_3], %3 {strides = array<i32>} : memref<3x16x4096xf32, #tpu.memory_space<vmem>>, vector<1x16x4096xf32>,
    %c1 = arith.constant 1 : index
    %c0_4 = arith.constant 0 : index
    %c0_5 = arith.constant 0 : index
    %4 = vector.load %arg2[%c1, %c0_4, %c0_5] : memref<3x16x4096xf32, #tpu.memory_space<vmem>>, vector<1x16x4096xf32>
    %5 = vector.shape_cast %4 : vector<1x16x4096xf32> to vector<16x4096xf32>
    %6 = vector.shape_cast %0 : vector<16x4096xf32> to vector<1x16x4096xf32>
    tpu.vector_store %arg2[%c1, %c0_4, %c0_5], %6 {strides = array<i32>} : memref<3x16x4096xf32, #tpu.memory_space<vmem>>, vector<1x16x4096xf32>,
    %c2 = arith.constant 2 : index
    %c0_6 = arith.constant 0 : index
    %c0_7 = arith.constant 0 : index
    %7 = vector.load %arg2[%c2, %c0_6, %c0_7] : memref<3x16x4096xf32, #tpu.memory_space<vmem>>, vector<1x16x4096xf32>
    %8 = vector.shape_cast %7 : vector<1x16x4096xf32> to vector<16x4096xf32>
    %9 = vector.shape_cast %0 : vector<16x4096xf32> to vector<1x16x4096xf32>
    tpu.vector_store %arg2[%c2, %c0_6, %c0_7], %9 {strides = array<i32>} : memref<3x16x4096xf32, #tpu.memory_space<vmem>>, vector<1x16x4096xf32>,
    return
  }
  func.func @transform_0(%arg0: i32) -> (i32, i32) {
    %c0_i32 = arith.constant 0 : i32
    %c0_i32_0 = arith.constant 0 : i32
    return %arg0, %c0_i32 : i32, i32
  }
  func.func @transform_1(%arg0: i32) -> (i32, i32, i32) {
    %c0_i32 = arith.constant 0 : i32
    %c0_i32_0 = arith.constant 0 : i32
    %c0_i32_1 = arith.constant 0 : i32
    return %c0_i32, %arg0, %c0_i32_0 : i32, i32, i32
  }
}

</mosaic_0001>

<bundles_post_ra>
// kernel: tpu_custom_call.1
= control target key start
LH: loop header
LB: loop body
LE: loop exit
PB: predicated region body
PF: predicated region fallthrough
CT: control target
= control target key end

     0   :  { %6 = vsyncpa [#allocation3], 0  ;;  %s1222_s0 = inlined_call_operand.hbm [shape: f32[32,4096], index: 0, kind: input, shape index: {}]   ;;  %s1223_s1 = inlined_call_operand.hbm [shape: f32[3,32,4096], index: 1, kind: output, shape index: {}]  }
   0x1   :  { %8 = vsyncpa [#allocation3 + $0x1], 0 }
   0x2   :  { %9 = vsyncpa [#allocation4], 0 }
   0x3   :  { %11 = vsyncpa [#allocation4 + $0x1], 0  ;;  %s811_s6 = smov 0   ;;  %s813_s7 = smov 0  }
   0x4   :  { %s815_s8 = smov 0   ;;  %s817_s9 = smov 0  }
   0x5 LB: > { %s832_s10 = sadd.s32 4294967295, %s789_s9   ;;  %s513_s11 = sadd.s32 4294967294, %s789_s9   ;;  %s789_s9 = sphi %s817_s9, %s1236_s9   ;;  %s785_s8 = sphi %s815_s8, %s1235_s8   ;;  %s781_s7 = sphi %s813_s7, %s1234_s7   ;;  %s777_s6 = sphi %s811_s6, %s1233_s6  }
   0x6   : > { %s836_s12 = sadd.s32 1, %s789_s9   ;;  %s24_s13 = sadd.s32 1, %s785_s8 }
   0x7   : > { %s21_s14 = ssub.s32 %s789_s9, %s836_s12  ;;  %p31_p0 = scmp.ne.s32.totalorder %s785_s8, %s781_s7 }
   0x8   : > { %p22_p1 = scmp.eq.s32.totalorder %s21_s14, 0  ;;  %p32_p2 = scmp.eq.s32.totalorder %s789_s9, 0 }
   0x9   : > { %p37_p3 = scmp.ne.s32.totalorder %s781_s7, %s777_s6  ;;  %p38_p4 = scmp.eq.s32.totalorder %s832_s10, 0 }
   0xa   : > { %s848_s15 = scalar_select %p22_p1, %s785_s8, %s24_s13  }
   0xb   : > { %p850_p5 = por %p32_p2, %p31_p0  ;;  %p854_p6 = por %p38_p4, %p37_p3 }
   0xc   : > { %p61_p7 = scmp.eq.s32.totalorder %s832_s10, 1  ;;  %p67_p8 = scmp.eq.s32.totalorder %s513_s11, 1 }
   0xd   : > { %p678_p10 = scmp.lt.s32.totalorder %s789_s9, 2  ;;  %s87_s20 = sand.u32 1, %s785_s8  }
   0xe   : > { %p861_p11 = por %p61_p7, %p31_p0  ;;  %p865_p12 = por %p67_p8, %p37_p3 }
   0xf   : > { %s656_s21 = sshll.u32 %s789_s9, 13  ;;  %s516_s22 = sshll.u32 %s87_s20, 9 }
  0x10   : > { %s1227_s18 = scalar_select %p861_p11, 1, 0 }
  0x11   : > { %s1228_s19 = scalar_select %p865_p12, 1, 0 }
  0x12   : > { %s874_s25 = scalar_lea.hbm %s1222_s0, %s656_s21  ;;  %s91_s26 = scalar_lea.vmem [#allocation2], %s516_s22 }
  0x13   : > { %s99_s27 = sshll.u32 %s91_s26, 4  ;;  %p878_p13 = pnand %p678_p10, %p850_p5  ;;  %s882_s27 = int_to_ptr.vmem [resolvable:$true] %s99_s27 }
  0x14   : > { %s884_s29 = scalar_lea.sflag [#allocation3], %s87_s20  ;;  %s721_s30 = scalar_lea.hbm %s874_s25, 8192 }
  0x15   : > { %p722_p0 = scmp.ne.s32.totalorder %s874_s25, %s721_s30  ;;  %p723_p1 = pneg %p878_p13 }
  0x16   : > { %s726_s4 = scalar_lea.hbm %s1222_s0, 16384  ;;  %p727_p4 = scmp.lt.u32.totalorder %s874_s25, %s1222_s0 }
  0x17   : > { %p724_p2 = pnand %p723_p1, %p722_p0  ;;  %p728_p5 = scmp.lt.u32.totalorder %s726_s4, %s721_s30 }
  0x18   : > { %p730_p8 = scmp.lt.u32.totalorder %s721_s30, %s874_s25 }
  0x19   : > { %p725_p3 = pneg %p724_p2  ;;  %p729_p7 = por %p728_p5, %p727_p4 }
  0x1b   : > { %p731_p10 = por %p730_p8, %p729_p7 }
  0x1d   : > { %p732_p9 = pnand %p731_p10, %p725_p3 }
  0x1f   : > { %735 = shalt.err (!%p732_p9)
}
  0x20   : > { %s736_s13 = scalar_lea.vmem %s882_s27, 8192  ;;  %s791_s14 = smov [#allocation2]  }
  0x21   : > { %p737_p0 = scmp.ne.s32.totalorder %s882_s27, %s736_s13  ;;  %s741_s16 = sshll.u32 %s791_s14, 4  ;;  %s742_s16 = int_to_ptr.vmem [resolvable:$false] %s741_s16 }
  0x22   : > { %s743_s20 = scalar_lea.vmem %s742_s16, 16384  ;;  %p744_p11 = scmp.lt.s32.totalorder %s882_s27, %s742_s16 }
  0x23   : > { %p739_p2 = pnand %p737_p0, %p723_p1  ;;  %p745_p4 = scmp.lt.s32.totalorder %s743_s20, %s736_s13 }
  0x25   : > { %p740_p12 = pneg %p739_p2  ;;  %p746_p5 = por %p745_p4, %p744_p11 }
  0x27   : > { %p747_p7 = pnand %p746_p5, %p740_p12 }
  0x29   : > { %750 = shalt.err (!%p747_p7)
}
  0x2a   : > { %s792_s21 = smov 4096   ;;  %s793_s22 = smov 256  }
  0x2b   : > { %673 = dma.hbm_to_vmem [thread:$0]  (!%p878_p13), %s874_s25, 8192, %s882_s27, %s884_s29, %s792_s21, %s792_s21, %s793_s22  }
  0x2c   : > { %p520_p9 = scmp.ge.s32.totalorder %s789_s9, 1  ;;  %p107_p1 = scmp.lt.s32.totalorder %s789_s9, 3 }
  0x2e   : > { %p108_p3 = pnand %p520_p9, %p107_p1 }
  0x2f   : > { %s915_s23 = sand.u32 (!%p108_p3), 1, %s781_s7  }
  0x30   : > { %111 = sbr.rel (%p108_p3) target bundleno = 166 (0xa6), region = 24  ;;  %s521_s24 = sshll.u32 (!%p108_p3), %s915_s23, 9 }
  0x31   : > { %s114_s26 = scalar_lea.sflag (!%p108_p3), [#allocation3], %s915_s23  ;;  %s919_s30 = scalar_lea.vmem (!%p108_p3), [#allocation2], %s521_s24 }
  0x37   : > { %768 = dma.done.wait (%p854_p6), %s114_s26, 8192  }
  0x38   : > { %770 = vsyncadd (%p854_p6), %s114_s26, 4294959104  ;;  %s659_s25 = smul.u32 1536, %s915_s23  ;;  %v138_v0 = vld [vmem:[%s919_s30] sm:$0xff]  ;;  %v139_v1 = vld [vmem:[%s919_s30 + $0x8] sm:$0xff]  ;;  %s397_s17 = scalar_lea.sflag [#allocation4], %s915_s23 }
  0x39   : > { %v140_v2 = vld [vmem:[%s919_s30 + $0x10] sm:$0xff]  ;;  %v141_v3 = vld [vmem:[%s919_s30 + $0x18] sm:$0xff]  ;;  %v142_v4 = vld [vmem:[%s919_s30 + $0x20] sm:$0xff] }
  0x3a   : > { %s929_s27 = scalar_lea.vmem [#allocation5], %s659_s25  ;;  %v143_v5 = vld [vmem:[%s919_s30 + $0x28] sm:$0xff]  ;;  %v144_v6 = vld [vmem:[%s919_s30 + $0x30] sm:$0xff]  ;;  %v145_v7 = vld [vmem:[%s919_s30 + $0x38] sm:$0xff] }
  0x3b   : > { %202 = vst [vmem:[%s929_s27] sm:$0xff] %v138_v0  ;;  %522 = vst [vmem:[%s929_s27 + $0x200] sm:$0xff] %v138_v0  ;;  %v146_v8 = vld [vmem:[%s919_s30 + $0x40] sm:$0xff]  ;;  %v147_v9 = vld [vmem:[%s919_s30 + $0x48] sm:$0xff] }
  0x3c   : > { %586 = vst [vmem:[%s929_s27 + $0x400] sm:$0xff] %v138_v0  ;;  %203 = vst [vmem:[%s929_s27 + $0x8] sm:$0xff] %v139_v1  ;;  %v148_v10 = vld [vmem:[%s919_s30 + $0x50] sm:$0xff]  ;;  %v149_v11 = vld [vmem:[%s919_s30 + $0x58] sm:$0xff] }
  0x3d   : > { %523 = vst [vmem:[%s929_s27 + $0x208] sm:$0xff] %v139_v1  ;;  %587 = vst [vmem:[%s929_s27 + $0x408] sm:$0xff] %v139_v1  ;;  %v150_v12 = vld [vmem:[%s919_s30 + $0x60] sm:$0xff]  ;;  %v151_v13 = vld [vmem:[%s919_s30 + $0x68] sm:$0xff] }
  0x3e   : > { %204 = vst [vmem:[%s929_s27 + $0x10] sm:$0xff] %v140_v2  ;;  %524 = vst [vmem:[%s929_s27 + $0x210] sm:$0xff] %v140_v2  ;;  %v152_v14 = vld [vmem:[%s919_s30 + $0x70] sm:$0xff]  ;;  %v153_v15 = vld [vmem:[%s919_s30 + $0x78] sm:$0xff] }
  0x3f   : > { %588 = vst [vmem:[%s929_s27 + $0x410] sm:$0xff] %v140_v2  ;;  %205 = vst [vmem:[%s929_s27 + $0x18] sm:$0xff] %v141_v3  ;;  %v154_v16 = vld [vmem:[%s919_s30 + $0x80] sm:$0xff]  ;;  %v155_v17 = vld [vmem:[%s919_s30 + $0x88] sm:$0xff] }
  0x40   : > { %525 = vst [vmem:[%s929_s27 + $0x218] sm:$0xff] %v141_v3  ;;  %589 = vst [vmem:[%s929_s27 + $0x418] sm:$0xff] %v141_v3  ;;  %v156_v18 = vld [vmem:[%s919_s30 + $0x90] sm:$0xff]  ;;  %v157_v19 = vld [vmem:[%s919_s30 + $0x98] sm:$0xff] }
  0x41   : > { %206 = vst [vmem:[%s929_s27 + $0x20] sm:$0xff] %v142_v4  ;;  %526 = vst [vmem:[%s929_s27 + $0x220] sm:$0xff] %v142_v4  ;;  %v158_v20 = vld [vmem:[%s919_s30 + $0xa0] sm:$0xff]  ;;  %v159_v21 = vld [vmem:[%s919_s30 + $0xa8] sm:$0xff] }
  0x42   : > { %590 = vst [vmem:[%s929_s27 + $0x420] sm:$0xff] %v142_v4  ;;  %207 = vst [vmem:[%s929_s27 + $0x28] sm:$0xff] %v143_v5  ;;  %v160_v22 = vld [vmem:[%s919_s30 + $0xb0] sm:$0xff]  ;;  %v161_v23 = vld [vmem:[%s919_s30 + $0xb8] sm:$0xff] }
  0x43   : > { %527 = vst [vmem:[%s929_s27 + $0x228] sm:$0xff] %v143_v5  ;;  %591 = vst [vmem:[%s929_s27 + $0x428] sm:$0xff] %v143_v5  ;;  %v162_v24 = vld [vmem:[%s919_s30 + $0xc0] sm:$0xff]  ;;  %v163_v25 = vld [vmem:[%s919_s30 + $0xc8] sm:$0xff] }
  0x44   : > { %208 = vst [vmem:[%s929_s27 + $0x30] sm:$0xff] %v144_v6  ;;  %528 = vst [vmem:[%s929_s27 + $0x230] sm:$0xff] %v144_v6  ;;  %v164_v26 = vld [vmem:[%s919_s30 + $0xd0] sm:$0xff]  ;;  %v165_v27 = vld [vmem:[%s919_s30 + $0xd8] sm:$0xff] }
  0x45   : > { %592 = vst [vmem:[%s929_s27 + $0x430] sm:$0xff] %v144_v6  ;;  %209 = vst [vmem:[%s929_s27 + $0x38] sm:$0xff] %v145_v7  ;;  %v166_v28 = vld [vmem:[%s919_s30 + $0xe0] sm:$0xff]  ;;  %v167_v29 = vld [vmem:[%s919_s30 + $0xe8] sm:$0xff] }
  0x46   : > { %529 = vst [vmem:[%s929_s27 + $0x238] sm:$0xff] %v145_v7  ;;  %593 = vst [vmem:[%s929_s27 + $0x438] sm:$0xff] %v145_v7  ;;  %v168_v30 = vld [vmem:[%s919_s30 + $0xf0] sm:$0xff]  ;;  %v169_v31 = vld [vmem:[%s919_s30 + $0xf8] sm:$0xff] }
  0x47   : > { %210 = vst [vmem:[%s929_s27 + $0x40] sm:$0xff] %v146_v8  ;;  %530 = vst [vmem:[%s929_s27 + $0x240] sm:$0xff] %v146_v8  ;;  %v170_v32 = vld [vmem:[%s919_s30 + $0x100] sm:$0xff]  ;;  %v171_v33 = vld [vmem:[%s919_s30 + $0x108] sm:$0xff] }
  0x48   : > { %594 = vst [vmem:[%s929_s27 + $0x440] sm:$0xff] %v146_v8  ;;  %211 = vst [vmem:[%s929_s27 + $0x48] sm:$0xff] %v147_v9  ;;  %v172_v34 = vld [vmem:[%s919_s30 + $0x110] sm:$0xff]  ;;  %v173_v35 = vld [vmem:[%s919_s30 + $0x118] sm:$0xff] }
  0x49   : > { %531 = vst [vmem:[%s929_s27 + $0x248] sm:$0xff] %v147_v9  ;;  %595 = vst [vmem:[%s929_s27 + $0x448] sm:$0xff] %v147_v9  ;;  %v174_v36 = vld [vmem:[%s919_s30 + $0x120] sm:$0xff]  ;;  %v175_v37 = vld [vmem:[%s919_s30 + $0x128] sm:$0xff] }
  0x4a   : > { %212 = vst [vmem:[%s929_s27 + $0x50] sm:$0xff] %v148_v10  ;;  %532 = vst [vmem:[%s929_s27 + $0x250] sm:$0xff] %v148_v10  ;;  %v176_v38 = vld [vmem:[%s919_s30 + $0x130] sm:$0xff]  ;;  %v177_v39 = vld [vmem:[%s919_s30 + $0x138] sm:$0xff] }
  0x4b   : > { %596 = vst [vmem:[%s929_s27 + $0x450] sm:$0xff] %v148_v10  ;;  %213 = vst [vmem:[%s929_s27 + $0x58] sm:$0xff] %v149_v11  ;;  %v178_v40 = vld [vmem:[%s919_s30 + $0x140] sm:$0xff]  ;;  %v179_v41 = vld [vmem:[%s919_s30 + $0x148] sm:$0xff] }
  0x4c   : > { %533 = vst [vmem:[%s929_s27 + $0x258] sm:$0xff] %v149_v11  ;;  %597 = vst [vmem:[%s929_s27 + $0x458] sm:$0xff] %v149_v11  ;;  %v180_v42 = vld [vmem:[%s919_s30 + $0x150] sm:$0xff]  ;;  %v181_v43 = vld [vmem:[%s919_s30 + $0x158] sm:$0xff] }
  0x4d   : > { %214 = vst [vmem:[%s929_s27 + $0x60] sm:$0xff] %v150_v12  ;;  %534 = vst [vmem:[%s929_s27 + $0x260] sm:$0xff] %v150_v12  ;;  %v182_v44 = vld [vmem:[%s919_s30 + $0x160] sm:$0xff]  ;;  %v183_v45 = vld [vmem:[%s919_s30 + $0x168] sm:$0xff] }
  0x4e   : > { %598 = vst [vmem:[%s929_s27 + $0x460] sm:$0xff] %v150_v12  ;;  %215 = vst [vmem:[%s929_s27 + $0x68] sm:$0xff] %v151_v13  ;;  %v184_v46 = vld [vmem:[%s919_s30 + $0x170] sm:$0xff]  ;;  %v185_v47 = vld [vmem:[%s919_s30 + $0x178] sm:$0xff] }
  0x4f   : > { %535 = vst [vmem:[%s929_s27 + $0x268] sm:$0xff] %v151_v13  ;;  %599 = vst [vmem:[%s929_s27 + $0x468] sm:$0xff] %v151_v13  ;;  %v186_v48 = vld [vmem:[%s919_s30 + $0x180] sm:$0xff]  ;;  %v187_v49 = vld [vmem:[%s919_s30 + $0x188] sm:$0xff] }
  0x50   : > { %216 = vst [vmem:[%s929_s27 + $0x70] sm:$0xff] %v152_v14  ;;  %536 = vst [vmem:[%s929_s27 + $0x270] sm:$0xff] %v152_v14  ;;  %v188_v50 = vld [vmem:[%s919_s30 + $0x190] sm:$0xff]  ;;  %v189_v51 = vld [vmem:[%s919_s30 + $0x198] sm:$0xff] }
  0x51   : > { %600 = vst [vmem:[%s929_s27 + $0x470] sm:$0xff] %v152_v14  ;;  %217 = vst [vmem:[%s929_s27 + $0x78] sm:$0xff] %v153_v15  ;;  %v190_v52 = vld [vmem:[%s919_s30 + $0x1a0] sm:$0xff]  ;;  %v191_v53 = vld [vmem:[%s919_s30 + $0x1a8] sm:$0xff] }
  0x52   : > { %537 = vst [vmem:[%s929_s27 + $0x278] sm:$0xff] %v153_v15  ;;  %601 = vst [vmem:[%s929_s27 + $0x478] sm:$0xff] %v153_v15  ;;  %v192_v54 = vld [vmem:[%s919_s30 + $0x1b0] sm:$0xff]  ;;  %v193_v55 = vld [vmem:[%s919_s30 + $0x1b8] sm:$0xff] }
  0x53   : > { %218 = vst [vmem:[%s929_s27 + $0x80] sm:$0xff] %v154_v16  ;;  %538 = vst [vmem:[%s929_s27 + $0x280] sm:$0xff] %v154_v16  ;;  %v194_v56 = vld [vmem:[%s919_s30 + $0x1c0] sm:$0xff]  ;;  %v195_v57 = vld [vmem:[%s919_s30 + $0x1c8] sm:$0xff] }
  0x54   : > { %602 = vst [vmem:[%s929_s27 + $0x480] sm:$0xff] %v154_v16  ;;  %219 = vst [vmem:[%s929_s27 + $0x88] sm:$0xff] %v155_v17  ;;  %v196_v58 = vld [vmem:[%s919_s30 + $0x1d0] sm:$0xff]  ;;  %v197_v59 = vld [vmem:[%s919_s30 + $0x1d8] sm:$0xff] }
  0x55   : > { %539 = vst [vmem:[%s929_s27 + $0x288] sm:$0xff] %v155_v17  ;;  %603 = vst [vmem:[%s929_s27 + $0x488] sm:$0xff] %v155_v17  ;;  %v198_v60 = vld [vmem:[%s919_s30 + $0x1e0] sm:$0xff]  ;;  %v199_v61 = vld [vmem:[%s919_s30 + $0x1e8] sm:$0xff] }
  0x56   : > { %220 = vst [vmem:[%s929_s27 + $0x90] sm:$0xff] %v156_v18  ;;  %540 = vst [vmem:[%s929_s27 + $0x290] sm:$0xff] %v156_v18  ;;  %v200_v62 = vld [vmem:[%s919_s30 + $0x1f0] sm:$0xff]  ;;  %v201_v63 = vld [vmem:[%s919_s30 + $0x1f8] sm:$0xff] }
  0x57   : > { %604 = vst [vmem:[%s929_s27 + $0x490] sm:$0xff] %v156_v18  ;;  %221 = vst [vmem:[%s929_s27 + $0x98] sm:$0xff] %v157_v19 }
  0x58   : > { %541 = vst [vmem:[%s929_s27 + $0x298] sm:$0xff] %v157_v19  ;;  %605 = vst [vmem:[%s929_s27 + $0x498] sm:$0xff] %v157_v19 }
  0x59   : > { %222 = vst [vmem:[%s929_s27 + $0xa0] sm:$0xff] %v158_v20  ;;  %542 = vst [vmem:[%s929_s27 + $0x2a0] sm:$0xff] %v158_v20 }
  0x5a   : > { %606 = vst [vmem:[%s929_s27 + $0x4a0] sm:$0xff] %v158_v20  ;;  %223 = vst [vmem:[%s929_s27 + $0xa8] sm:$0xff] %v159_v21 }
  0x5b   : > { %543 = vst [vmem:[%s929_s27 + $0x2a8] sm:$0xff] %v159_v21  ;;  %607 = vst [vmem:[%s929_s27 + $0x4a8] sm:$0xff] %v159_v21 }
  0x5c   : > { %224 = vst [vmem:[%s929_s27 + $0xb0] sm:$0xff] %v160_v22  ;;  %544 = vst [vmem:[%s929_s27 + $0x2b0] sm:$0xff] %v160_v22 }
  0x5d   : > { %608 = vst [vmem:[%s929_s27 + $0x4b0] sm:$0xff] %v160_v22  ;;  %225 = vst [vmem:[%s929_s27 + $0xb8] sm:$0xff] %v161_v23 }
  0x5e   : > { %545 = vst [vmem:[%s929_s27 + $0x2b8] sm:$0xff] %v161_v23  ;;  %609 = vst [vmem:[%s929_s27 + $0x4b8] sm:$0xff] %v161_v23 }
  0x5f   : > { %226 = vst [vmem:[%s929_s27 + $0xc0] sm:$0xff] %v162_v24  ;;  %546 = vst [vmem:[%s929_s27 + $0x2c0] sm:$0xff] %v162_v24 }
  0x60   : > { %610 = vst [vmem:[%s929_s27 + $0x4c0] sm:$0xff] %v162_v24  ;;  %227 = vst [vmem:[%s929_s27 + $0xc8] sm:$0xff] %v163_v25 }
  0x61   : > { %547 = vst [vmem:[%s929_s27 + $0x2c8] sm:$0xff] %v163_v25  ;;  %611 = vst [vmem:[%s929_s27 + $0x4c8] sm:$0xff] %v163_v25 }
  0x62   : > { %228 = vst [vmem:[%s929_s27 + $0xd0] sm:$0xff] %v164_v26  ;;  %548 = vst [vmem:[%s929_s27 + $0x2d0] sm:$0xff] %v164_v26 }
  0x63   : > { %612 = vst [vmem:[%s929_s27 + $0x4d0] sm:$0xff] %v164_v26  ;;  %229 = vst [vmem:[%s929_s27 + $0xd8] sm:$0xff] %v165_v27 }
  0x64   : > { %549 = vst [vmem:[%s929_s27 + $0x2d8] sm:$0xff] %v165_v27  ;;  %613 = vst [vmem:[%s929_s27 + $0x4d8] sm:$0xff] %v165_v27 }
  0x65   : > { %230 = vst [vmem:[%s929_s27 + $0xe0] sm:$0xff] %v166_v28  ;;  %550 = vst [vmem:[%s929_s27 + $0x2e0] sm:$0xff] %v166_v28 }
  0x66   : > { %614 = vst [vmem:[%s929_s27 + $0x4e0] sm:$0xff] %v166_v28  ;;  %231 = vst [vmem:[%s929_s27 + $0xe8] sm:$0xff] %v167_v29 }
  0x67   : > { %551 = vst [vmem:[%s929_s27 + $0x2e8] sm:$0xff] %v167_v29  ;;  %615 = vst [vmem:[%s929_s27 + $0x4e8] sm:$0xff] %v167_v29 }
  0x68   : > { %232 = vst [vmem:[%s929_s27 + $0xf0] sm:$0xff] %v168_v30  ;;  %552 = vst [vmem:[%s929_s27 + $0x2f0] sm:$0xff] %v168_v30 }
  0x69   : > { %616 = vst [vmem:[%s929_s27 + $0x4f0] sm:$0xff] %v168_v30  ;;  %233 = vst [vmem:[%s929_s27 + $0xf8] sm:$0xff] %v169_v31 }
  0x6a   : > { %553 = vst [vmem:[%s929_s27 + $0x2f8] sm:$0xff] %v169_v31  ;;  %617 = vst [vmem:[%s929_s27 + $0x4f8] sm:$0xff] %v169_v31 }
  0x6b   : > { %234 = vst [vmem:[%s929_s27 + $0x100] sm:$0xff] %v170_v32  ;;  %554 = vst [vmem:[%s929_s27 + $0x300] sm:$0xff] %v170_v32 }
  0x6c   : > { %618 = vst [vmem:[%s929_s27 + $0x500] sm:$0xff] %v170_v32  ;;  %235 = vst [vmem:[%s929_s27 + $0x108] sm:$0xff] %v171_v33 }
  0x6d   : > { %555 = vst [vmem:[%s929_s27 + $0x308] sm:$0xff] %v171_v33  ;;  %619 = vst [vmem:[%s929_s27 + $0x508] sm:$0xff] %v171_v33 }
  0x6e   : > { %236 = vst [vmem:[%s929_s27 + $0x110] sm:$0xff] %v172_v34  ;;  %556 = vst [vmem:[%s929_s27 + $0x310] sm:$0xff] %v172_v34 }
  0x6f   : > { %620 = vst [vmem:[%s929_s27 + $0x510] sm:$0xff] %v172_v34  ;;  %237 = vst [vmem:[%s929_s27 + $0x118] sm:$0xff] %v173_v35 }
  0x70   : > { %557 = vst [vmem:[%s929_s27 + $0x318] sm:$0xff] %v173_v35  ;;  %621 = vst [vmem:[%s929_s27 + $0x518] sm:$0xff] %v173_v35 }
  0x71   : > { %238 = vst [vmem:[%s929_s27 + $0x120] sm:$0xff] %v174_v36  ;;  %558 = vst [vmem:[%s929_s27 + $0x320] sm:$0xff] %v174_v36 }
  0x72   : > { %622 = vst [vmem:[%s929_s27 + $0x520] sm:$0xff] %v174_v36  ;;  %239 = vst [vmem:[%s929_s27 + $0x128] sm:$0xff] %v175_v37 }
  0x73   : > { %559 = vst [vmem:[%s929_s27 + $0x328] sm:$0xff] %v175_v37  ;;  %623 = vst [vmem:[%s929_s27 + $0x528] sm:$0xff] %v175_v37 }
  0x74   : > { %240 = vst [vmem:[%s929_s27 + $0x130] sm:$0xff] %v176_v38  ;;  %560 = vst [vmem:[%s929_s27 + $0x330] sm:$0xff] %v176_v38 }
  0x75   : > { %624 = vst [vmem:[%s929_s27 + $0x530] sm:$0xff] %v176_v38  ;;  %241 = vst [vmem:[%s929_s27 + $0x138] sm:$0xff] %v177_v39 }
  0x76   : > { %561 = vst [vmem:[%s929_s27 + $0x338] sm:$0xff] %v177_v39  ;;  %625 = vst [vmem:[%s929_s27 + $0x538] sm:$0xff] %v177_v39 }
  0x77   : > { %242 = vst [vmem:[%s929_s27 + $0x140] sm:$0xff] %v178_v40  ;;  %562 = vst [vmem:[%s929_s27 + $0x340] sm:$0xff] %v178_v40 }
  0x78   : > { %626 = vst [vmem:[%s929_s27 + $0x540] sm:$0xff] %v178_v40  ;;  %243 = vst [vmem:[%s929_s27 + $0x148] sm:$0xff] %v179_v41 }
  0x79   : > { %563 = vst [vmem:[%s929_s27 + $0x348] sm:$0xff] %v179_v41  ;;  %627 = vst [vmem:[%s929_s27 + $0x548] sm:$0xff] %v179_v41 }
  0x7a   : > { %244 = vst [vmem:[%s929_s27 + $0x150] sm:$0xff] %v180_v42  ;;  %564 = vst [vmem:[%s929_s27 + $0x350] sm:$0xff] %v180_v42 }
  0x7b   : > { %628 = vst [vmem:[%s929_s27 + $0x550] sm:$0xff] %v180_v42  ;;  %245 = vst [vmem:[%s929_s27 + $0x158] sm:$0xff] %v181_v43 }
  0x7c   : > { %565 = vst [vmem:[%s929_s27 + $0x358] sm:$0xff] %v181_v43  ;;  %629 = vst [vmem:[%s929_s27 + $0x558] sm:$0xff] %v181_v43 }
  0x7d   : > { %246 = vst [vmem:[%s929_s27 + $0x160] sm:$0xff] %v182_v44  ;;  %566 = vst [vmem:[%s929_s27 + $0x360] sm:$0xff] %v182_v44 }
  0x7e   : > { %630 = vst [vmem:[%s929_s27 + $0x560] sm:$0xff] %v182_v44  ;;  %247 = vst [vmem:[%s929_s27 + $0x168] sm:$0xff] %v183_v45 }
  0x7f   : > { %567 = vst [vmem:[%s929_s27 + $0x368] sm:$0xff] %v183_v45  ;;  %631 = vst [vmem:[%s929_s27 + $0x568] sm:$0xff] %v183_v45 }
  0x80   : > { %248 = vst [vmem:[%s929_s27 + $0x170] sm:$0xff] %v184_v46  ;;  %568 = vst [vmem:[%s929_s27 + $0x370] sm:$0xff] %v184_v46 }
  0x81   : > { %632 = vst [vmem:[%s929_s27 + $0x570] sm:$0xff] %v184_v46  ;;  %249 = vst [vmem:[%s929_s27 + $0x178] sm:$0xff] %v185_v47 }
  0x82   : > { %569 = vst [vmem:[%s929_s27 + $0x378] sm:$0xff] %v185_v47  ;;  %633 = vst [vmem:[%s929_s27 + $0x578] sm:$0xff] %v185_v47 }
  0x83   : > { %250 = vst [vmem:[%s929_s27 + $0x180] sm:$0xff] %v186_v48  ;;  %570 = vst [vmem:[%s929_s27 + $0x380] sm:$0xff] %v186_v48 }
  0x84   : > { %634 = vst [vmem:[%s929_s27 + $0x580] sm:$0xff] %v186_v48  ;;  %251 = vst [vmem:[%s929_s27 + $0x188] sm:$0xff] %v187_v49 }
  0x85   : > { %571 = vst [vmem:[%s929_s27 + $0x388] sm:$0xff] %v187_v49  ;;  %635 = vst [vmem:[%s929_s27 + $0x588] sm:$0xff] %v187_v49 }
  0x86   : > { %252 = vst [vmem:[%s929_s27 + $0x190] sm:$0xff] %v188_v50  ;;  %572 = vst [vmem:[%s929_s27 + $0x390] sm:$0xff] %v188_v50 }
  0x87   : > { %636 = vst [vmem:[%s929_s27 + $0x590] sm:$0xff] %v188_v50  ;;  %253 = vst [vmem:[%s929_s27 + $0x198] sm:$0xff] %v189_v51 }
  0x88   : > { %573 = vst [vmem:[%s929_s27 + $0x398] sm:$0xff] %v189_v51  ;;  %637 = vst [vmem:[%s929_s27 + $0x598] sm:$0xff] %v189_v51 }
  0x89   : > { %254 = vst [vmem:[%s929_s27 + $0x1a0] sm:$0xff] %v190_v52  ;;  %574 = vst [vmem:[%s929_s27 + $0x3a0] sm:$0xff] %v190_v52 }
  0x8a   : > { %638 = vst [vmem:[%s929_s27 + $0x5a0] sm:$0xff] %v190_v52  ;;  %255 = vst [vmem:[%s929_s27 + $0x1a8] sm:$0xff] %v191_v53 }
  0x8b   : > { %575 = vst [vmem:[%s929_s27 + $0x3a8] sm:$0xff] %v191_v53  ;;  %639 = vst [vmem:[%s929_s27 + $0x5a8] sm:$0xff] %v191_v53 }
  0x8c   : > { %256 = vst [vmem:[%s929_s27 + $0x1b0] sm:$0xff] %v192_v54  ;;  %576 = vst [vmem:[%s929_s27 + $0x3b0] sm:$0xff] %v192_v54 }
  0x8d   : > { %640 = vst [vmem:[%s929_s27 + $0x5b0] sm:$0xff] %v192_v54  ;;  %257 = vst [vmem:[%s929_s27 + $0x1b8] sm:$0xff] %v193_v55 }
  0x8e   : > { %577 = vst [vmem:[%s929_s27 + $0x3b8] sm:$0xff] %v193_v55  ;;  %641 = vst [vmem:[%s929_s27 + $0x5b8] sm:$0xff] %v193_v55 }
  0x8f   : > { %258 = vst [vmem:[%s929_s27 + $0x1c0] sm:$0xff] %v194_v56  ;;  %578 = vst [vmem:[%s929_s27 + $0x3c0] sm:$0xff] %v194_v56 }
  0x90   : > { %642 = vst [vmem:[%s929_s27 + $0x5c0] sm:$0xff] %v194_v56  ;;  %259 = vst [vmem:[%s929_s27 + $0x1c8] sm:$0xff] %v195_v57 }
  0x91   : > { %579 = vst [vmem:[%s929_s27 + $0x3c8] sm:$0xff] %v195_v57  ;;  %643 = vst [vmem:[%s929_s27 + $0x5c8] sm:$0xff] %v195_v57 }
  0x92   : > { %260 = vst [vmem:[%s929_s27 + $0x1d0] sm:$0xff] %v196_v58  ;;  %580 = vst [vmem:[%s929_s27 + $0x3d0] sm:$0xff] %v196_v58 }
  0x93   : > { %644 = vst [vmem:[%s929_s27 + $0x5d0] sm:$0xff] %v196_v58  ;;  %261 = vst [vmem:[%s929_s27 + $0x1d8] sm:$0xff] %v197_v59 }
  0x94   : > { %581 = vst [vmem:[%s929_s27 + $0x3d8] sm:$0xff] %v197_v59  ;;  %645 = vst [vmem:[%s929_s27 + $0x5d8] sm:$0xff] %v197_v59 }
  0x95   : > { %262 = vst [vmem:[%s929_s27 + $0x1e0] sm:$0xff] %v198_v60  ;;  %582 = vst [vmem:[%s929_s27 + $0x3e0] sm:$0xff] %v198_v60 }
  0x96   : > { %646 = vst [vmem:[%s929_s27 + $0x5e0] sm:$0xff] %v198_v60  ;;  %263 = vst [vmem:[%s929_s27 + $0x1e8] sm:$0xff] %v199_v61 }
  0x97   : > { %583 = vst [vmem:[%s929_s27 + $0x3e8] sm:$0xff] %v199_v61  ;;  %647 = vst [vmem:[%s929_s27 + $0x5e8] sm:$0xff] %v199_v61 }
  0x98   : > { %264 = vst [vmem:[%s929_s27 + $0x1f0] sm:$0xff] %v200_v62  ;;  %584 = vst [vmem:[%s929_s27 + $0x3f0] sm:$0xff] %v200_v62 }
  0x99   : > { %648 = vst [vmem:[%s929_s27 + $0x5f0] sm:$0xff] %v200_v62  ;;  %265 = vst [vmem:[%s929_s27 + $0x1f8] sm:$0xff] %v201_v63 }
  0x9a   : > { %585 = vst [vmem:[%s929_s27 + $0x3f8] sm:$0xff] %v201_v63  ;;  %649 = vst [vmem:[%s929_s27 + $0x5f8] sm:$0xff] %v201_v63 }
  0x9b   : > { %s658_s28 = sshll.u32 %s832_s10, 13  ;;  %s427_s29 = sshll.u32 %s929_s27, 4  ;;  %s428_s29 = int_to_ptr.vmem [resolvable:$true] %s427_s29 }
  0x9c   : > { %s410_s4 = scalar_lea.hbm %s1223_s1, %s658_s28  ;;  %s794_s5 = smov 8192  }
  0x9d   : > { %p1230_p6 = scmp.ne.s32.totalorder %s1227_s18, 0  ;;  %s795_s11 = smov 16384  }
  0x9e   : > { %s796_s13 = smov 2   ;;  %s797_s14 = smov 4096  }
  0x9f   : > { %662 = sst [smem:[#allocation7]] (%p1230_p6), %s794_s5  ;;  %s798_s10 = smov 256  }
  0xa0   : > { %663 = sst [smem:[#allocation7 + $0x1]] (%p1230_p6), %s795_s11  ;;  %s799_s16 = smov [#allocation6]  }
  0xa1   : > { %664 = sst [smem:[#allocation7 + $0x2]] (%p1230_p6), %s796_s13  ;;  %s800_s20 = smov 0  }
  0xa2   : > { %665 = sst [smem:[#allocation7 + $0x3]] (%p1230_p6), %s797_s14 }
  0xa3   : > { %666 = sst [smem:[#allocation7 + $0x4]] (%p1230_p6), %s797_s14 }
  0xa4   : > { %667 = sst [smem:[#allocation7 + $0x5]] (%p1230_p6), %s798_s10 }
  0xa5   : > { %668 = dma.general (%p1230_p6), %s428_s29, 24576, %s410_s4, %s397_s17, %s799_s16, [#allocation7], %s800_s20, 0  }
  0xa6 PF: > { %s455_s21 = sand.u32 1, %s777_s6   ;;  %p1231_p11 = scmp.ne.s32.totalorder %s1228_s19, 0 }
  0xa7   : > { %p1232_p12 = scmp.ge.s32.totalorder %s789_s9, 2  ;;  %s456_s22 = scalar_lea.sflag [#allocation4], %s455_s21 }
  0xa9   : > { %p675_p13 = pnand %p1232_p12, %p1231_p11 }
  0xab   : > { %772 = dma.done.wait (!%p675_p13), %s456_s22, 24576  }
  0xac   : > { %774 = vsyncadd (!%p675_p13), %s456_s22, 4294942720  ;;  %p14_p8 = scmp.ge.s32.totalorder %s836_s12, 4   ;;  %s1233_s6 = smov %s781_s7 }
  0xad   : > { %s1234_s7 = smov %s785_s8  ;;  %s1235_s8 = smov %s848_s15 }
  0xae   : > { %s1236_s9 = smov %s836_s12  ;;  %16 = sbr.rel (!%p14_p8) target bundleno = 5 (0x5), region = 76 }
  0xb5   :  { %461 = vsyncpa [#allocation3], 1 }
  0xb6   :  { %463 = vsyncpa [#allocation3 + $0x1], 1 }
  0xb7   :  { %464 = vsyncpa [#allocation4], 1 }
  0xb8   :  { %466 = vsyncpa [#allocation4 + $0x1], 1 }

</bundles_post_ra>
